<compile_context>
chip_gen: v5e
topology: v5e:2x2
jax: 0.10.0
libtpu: 0.0.40
codegen_flags: <defaults>
</compile_context>

<pallas_src>
import numpy as np
import jax
import jax.numpy as jnp
from jax.experimental import pallas as pl
from jax.experimental.pallas import tpu as pltpu


# ---------------------------------------------------------------------------
# Eigen / XLA f32 erf rational:  erf(z) ~= z * P(z^2) / Q(z^2),  z in [-4, 4].
# Q(z^2) is strictly negative on the domain, so Q_hi * Q_lo > 0 (no div-by-0).
# ---------------------------------------------------------------------------
_ERF_ALPHA = (-2.72614225801306e-10, 2.77068142495902e-08, -2.10102402082508e-06,
              -5.69250639462346e-05, -7.34990630326855e-04, -2.95459980854025e-03,
              -1.60960333262415e-02)
_ERF_BETA = (-1.45660718464996e-05, -2.13374055278905e-04, -1.68282697438203e-03,
             -7.37332916720468e-03, -1.42647390514189e-02)

_INV_SQRT2 = 0.7071067811865476


def _erf_ratio(z):
    """Return (P(z^2), Q(z^2)) for the Eigen erf rational (no divide here)."""
    z2 = z * z
    num = jnp.float32(_ERF_ALPHA[0])
    for a in _ERF_ALPHA[1:]:
        num = num * z2 + jnp.float32(a)
    den = jnp.float32(_ERF_BETA[0])
    for b in _ERF_BETA[1:]:
        den = den * z2 + jnp.float32(b)
    return num, den


# ---------------------------------------------------------------------------
# Pallas kernel: one (tr, 128) tile.  x block is (1, tr, 128); p block is
# (1, 2, tr, 128) carrying the mean tile (index 0) and scale tile (index 1).
# ---------------------------------------------------------------------------
def _likelihood_kernel(x_ref, p_ref, like_ref):
    x = x_ref[0, :, :]
    mu = p_ref[0, 0, :, :]
    sc = jnp.maximum(p_ref[0, 1, :, :], 1e-9)       # torch.clamp(scale, min=1e-9)

    # 1/sigma: EUP approx reciprocal + one Newton step (rel err ~1e-7),
    # then fold in 1/sqrt(2).  Saves an exact f32 divide per element.
    r = pl.reciprocal(sc, approx=True)
    r = r * (2.0 - sc * r)
    inv = r * jnp.float32(_INV_SQRT2)

    d = x - mu                                       # computed once, ±0.5 folded in
    z_hi = jnp.clip((d + 0.5) * inv, -4.0, 4.0)      # single clip per erf argument
    z_lo = jnp.clip((d - 0.5) * inv, -4.0, 4.0)

    p_hi, q_hi = _erf_ratio(z_hi)
    p_lo, q_lo = _erf_ratio(z_lo)

    # erf_hi - erf_lo fused over a single shared divide; always >= 0, so the
    # PyTorch abs() is redundant (the 1e-6 floor absorbs sub-ulp cancellation).
    num = (z_hi * p_hi) * q_lo - (z_lo * p_lo) * q_hi
    like = (0.5 * num) / (q_hi * q_lo)               # 0.5 * (erf_hi - erf_lo)
    like_ref[0, :, :] = jnp.maximum(like, 1e-6)      # Low_bound forward


# ---------------------------------------------------------------------------
# Wrapper: free reshapes + pallas_call (no HBM copies when C*H*W % 128 == 0).
# ---------------------------------------------------------------------------
def distribution_for_entropy_forward(x, p_dec, *, max_tile_rows=2048):
    N, C, H, W = x.shape
    assert p_dec.shape == (N, 2 * C, H, W), "p_dec must carry [mean, scale]"
    x_orig = x

    if x.dtype != jnp.float32:
        x = x.astype(jnp.float32)
    if p_dec.dtype != jnp.float32:
        p_dec = p_dec.astype(jnp.float32)
    # TODO(synk): optional bf16-input variant for v5e bandwidth would need a
    # relaxed accuracy tolerance; kept f32-in/f32-out here.

    lanes = 128
    m = C * H * W                       # per-batch elements
    total = N * m

    if m % lanes == 0:
        # Zero-copy path: pure row-major-compatible reshapes (bitcasts).
        rows_b = m // lanes
        pad = 0
        x3 = x.reshape(N, rows_b, lanes)
        p4 = p_dec.reshape(N, 2, rows_b, lanes)
    else:
        # Rare ragged case: per-batch tail pad (this path does copy).
        rows_b = pl.cdiv(m, lanes)
        pad = rows_b * lanes - m
        x3 = jnp.pad(x.reshape(N, m), ((0, 0), (0, pad))
                     ).reshape(N, rows_b, lanes)
        p4 = jnp.pad(p_dec.reshape(N, 2, m), ((0, 0), (0, 0), (0, pad))
                     ).reshape(N, 2, rows_b, lanes)

    # Row-tile size: whole per-batch stream if small, else a multiple-of-8 cap.
    # tr = 2048 -> (1 + 2 + 1) MiB/step, x2 double-buffered = 8 MiB: inside the
    # scoped-VMEM default on every TPU generation.
    if rows_b <= max_tile_rows:
        tr = rows_b
    else:
        tr = max(8, (max_tile_rows // 8) * 8)
    grid = (N, pl.cdiv(rows_b, tr))

    x_spec = pl.BlockSpec((1, tr, lanes), lambda n, i: (n, i, 0))
    p_spec = pl.BlockSpec((1, 2, tr, lanes), lambda n, i: (n, 0, i, 0))
    o_spec = pl.BlockSpec((1, tr, lanes), lambda n, i: (n, i, 0))

    # ~60 VPU flops/elem, 2 reciprocal/divide ops/elem, 16 B/elem (3 in + 1 out).
    cost = pl.CostEstimate(flops=60 * total,
                           transcendentals=2 * total,
                           bytes_accessed=16 * total)

    like3 = pl.pallas_call(
        _likelihood_kernel,
        out_shape=jax.ShapeDtypeStruct((N, rows_b, lanes), jnp.float32),
        grid=grid,
        in_specs=[x_spec, p_spec],
        out_specs=o_spec,
        compiler_params=pltpu.CompilerParams(
            dimension_semantics=("parallel", "parallel")),
        cost_estimate=cost,
    )(x3, p4)

    if pad:
        likelihood = like3.reshape(N, rows_b * lanes)[:, :m].reshape(N, C, H, W)
    else:
        likelihood = like3.reshape(N, C, H, W)       # free reshape
    # The module returns x unchanged; no need to stream it through the kernel.
    return x_orig, likelihood


# ---------------------------------------------------------------------------
# Pure-JAX reference (mirrors the PyTorch forward exactly).
# ---------------------------------------------------------------------------
def reference_forward(x, p_dec):
    C = p_dec.shape[1] // 2
    mean = p_dec[:, :C]
    scale = jnp.maximum(p_dec[:, C:], 1e-9)

    def cdf(v):  # torch Normal.cdf
        return 0.5 * (1.0 + jax.scipy.special.erf(
            (v - mean) / (scale * np.sqrt(2.0))))

    like = jnp.abs(cdf(x + 0.5) - cdf(x - 0.5))
    like = jnp.maximum(like, 1e-6)   # Low_bound forward
    return x, like


# ---------------------------------------------------------------------------
if __name__ == "__main__":
    key = jax.random.PRNGKey(0)
    kx, km, ks = jax.random.split(key, 3)

    N, C, H, W = 2, 4, 16, 16
    # x behaves like a (rounded) latent; mean/scale come from a hyper-decoder.
    x = jnp.round(jax.random.normal(kx, (N, C, H, W), dtype=jnp.float32) * 3.0)
    mean = jax.random.normal(km, (N, C, H, W), dtype=jnp.float32)
    scale = jax.nn.softplus(jax.random.normal(ks, (N, C, H, W), dtype=jnp.float32))
    p_dec = jnp.concatenate([mean, scale], axis=1)          # (N, 2C, H, W)

    # TODO(synk): Low_bound's custom backward (gradient gating) is a
    # training-time autograd detail and is not part of the forward kernel.
    x_out, likelihood = jax.jit(distribution_for_entropy_forward)(x, p_dec)
    jax.block_until_ready((x_out, likelihood))

    x_ref, like_ref = reference_forward(x, p_dec)
    np.testing.assert_allclose(np.asarray(x_out), np.asarray(x_ref),
                               rtol=0.0, atol=0.0)
    np.testing.assert_allclose(np.asarray(likelihood), np.asarray(like_ref),
                               rtol=1e-5, atol=1e-5)

    print("KERNEL_OK")
</pallas_src>

<mosaic_0001>
module attributes {stable_mosaic.version = 11 : i64} {
  func.func @_likelihood_kernel(%arg0: i32, %arg1: i32, %arg2: memref<1x8x128xf32, #tpu.memory_space<vmem>>, %arg3: memref<1x2x8x128xf32, #tpu.memory_space<vmem>>, %arg4: memref<1x8x128xf32, #tpu.memory_space<vmem>>) attributes {dimension_semantics = [#tpu.dimension_semantics<parallel>, #tpu.dimension_semantics<parallel>], iteration_bounds = array<i64: 2, 1>, scalar_prefetch = 0 : i64, scratch_operands = 0 : i64, tpu.core_type = #tpu.core_type<tc>, window_params = [{transform_indices = @transform_0, window_bounds = array<i64: 1, 8, 128>}, {transform_indices = @transform_1, window_bounds = array<i64: 1, 2, 8, 128>}, {transform_indices = @transform_2, window_bounds = array<i64: 1, 8, 128>}]} {
    %c0 = arith.constant 0 : index
    %c0_0 = arith.constant 0 : index
    %c0_1 = arith.constant 0 : index
    %0 = vector.load %arg2[%c0, %c0_0, %c0_1] : memref<1x8x128xf32, #tpu.memory_space<vmem>>, vector<1x8x128xf32>
    %1 = vector.shape_cast %0 : vector<1x8x128xf32> to vector<8x128xf32>
    %c0_2 = arith.constant 0 : index
    %c0_3 = arith.constant 0 : index
    %c0_4 = arith.constant 0 : index
    %c0_5 = arith.constant 0 : index
    %2 = vector.load %arg3[%c0_2, %c0_3, %c0_4, %c0_5] : memref<1x2x8x128xf32, #tpu.memory_space<vmem>>, vector<1x1x8x128xf32>
    %3 = vector.shape_cast %2 : vector<1x1x8x128xf32> to vector<8x128xf32>
    %c0_6 = arith.constant 0 : index
    %c1 = arith.constant 1 : index
    %c0_7 = arith.constant 0 : index
    %c0_8 = arith.constant 0 : index
    %4 = vector.load %arg3[%c0_6, %c1, %c0_7, %c0_8] : memref<1x2x8x128xf32, #tpu.memory_space<vmem>>, vector<1x1x8x128xf32>
    %5 = vector.shape_cast %4 : vector<1x1x8x128xf32> to vector<8x128xf32>
    %cst = arith.constant 9.99999971E-10 : f32
    %6 = vector.broadcast %cst : f32 to vector<8x128xf32>
    %7 = arith.maximumf %5, %6 : vector<8x128xf32>
    %8 = tpu.reciprocal %7 {approx = true} : vector<8x128xf32> -> vector<8x128xf32>
    %9 = arith.mulf %7, %8 : vector<8x128xf32>
    %cst_9 = arith.constant 2.000000e+00 : f32
    %10 = vector.broadcast %cst_9 : f32 to vector<8x128xf32>
    %11 = arith.subf %10, %9 : vector<8x128xf32>
    %12 = arith.mulf %8, %11 : vector<8x128xf32>
    %cst_10 = arith.constant 0.707106769 : f32
    %13 = vector.broadcast %cst_10 : f32 to vector<8x128xf32>
    %14 = arith.mulf %12, %13 : vector<8x128xf32>
    %15 = arith.subf %1, %3 : vector<8x128xf32>
    %cst_11 = arith.constant 5.000000e-01 : f32
    %16 = vector.broadcast %cst_11 : f32 to vector<8x128xf32>
    %17 = arith.addf %15, %16 : vector<8x128xf32>
    %18 = arith.mulf %17, %14 : vector<8x128xf32>
    %cst_12 = arith.constant -4.000000e+00 : f32
    %cst_13 = arith.constant 4.000000e+00 : f32
    %19 = vector.broadcast %cst_12 : f32 to vector<8x128xf32>
    %20 = arith.maximumf %19, %18 : vector<8x128xf32>
    %21 = vector.broadcast %cst_13 : f32 to vector<8x128xf32>
    %22 = arith.minimumf %21, %20 : vector<8x128xf32>
    %cst_14 = arith.constant 5.000000e-01 : f32
    %23 = vector.broadcast %cst_14 : f32 to vector<8x128xf32>
    %24 = arith.subf %15, %23 : vector<8x128xf32>
    %25 = arith.mulf %24, %14 : vector<8x128xf32>
    %cst_15 = arith.constant -4.000000e+00 : f32
    %cst_16 = arith.constant 4.000000e+00 : f32
    %26 = vector.broadcast %cst_15 : f32 to vector<8x128xf32>
    %27 = arith.maximumf %26, %25 : vector<8x128xf32>
    %28 = vector.broadcast %cst_16 : f32 to vector<8x128xf32>
    %29 = arith.minimumf %28, %27 : vector<8x128xf32>
    %30 = arith.mulf %22, %22 : vector<8x128xf32>
    %cst_17 = arith.constant -2.72614237E-10 : f32
    %31 = vector.broadcast %cst_17 : f32 to vector<8x128xf32>
    %32 = arith.mulf %31, %30 : vector<8x128xf32>
    %cst_18 = arith.constant 2.77068146E-8 : f32
    %33 = vector.broadcast %cst_18 : f32 to vector<8x128xf32>
    %34 = arith.addf %32, %33 : vector<8x128xf32>
    %35 = arith.mulf %34, %30 : vector<8x128xf32>
    %cst_19 = arith.constant -2.10102394E-6 : f32
    %36 = vector.broadcast %cst_19 : f32 to vector<8x128xf32>
    %37 = arith.addf %35, %36 : vector<8x128xf32>
    %38 = arith.mulf %37, %30 : vector<8x128xf32>
    %cst_20 = arith.constant -5.69250624E-5 : f32
    %39 = vector.broadcast %cst_20 : f32 to vector<8x128xf32>
    %40 = arith.addf %38, %39 : vector<8x128xf32>
    %41 = arith.mulf %40, %30 : vector<8x128xf32>
    %cst_21 = arith.constant -7.34990637E-4 : f32
    %42 = vector.broadcast %cst_21 : f32 to vector<8x128xf32>
    %43 = arith.addf %41, %42 : vector<8x128xf32>
    %44 = arith.mulf %43, %30 : vector<8x128xf32>
    %cst_22 = arith.constant -2.954600e-03 : f32
    %45 = vector.broadcast %cst_22 : f32 to vector<8x128xf32>
    %46 = arith.addf %44, %45 : vector<8x128xf32>
    %47 = arith.mulf %46, %30 : vector<8x128xf32>
    %cst_23 = arith.constant -0.0160960332 : f32
    %48 = vector.broadcast %cst_23 : f32 to vector<8x128xf32>
    %49 = arith.addf %47, %48 : vector<8x128xf32>
    %cst_24 = arith.constant -1.45660715E-5 : f32
    %50 = vector.broadcast %cst_24 : f32 to vector<8x128xf32>
    %51 = arith.mulf %50, %30 : vector<8x128xf32>
    %cst_25 = arith.constant -2.13374049E-4 : f32
    %52 = vector.broadcast %cst_25 : f32 to vector<8x128xf32>
    %53 = arith.addf %51, %52 : vector<8x128xf32>
    %54 = arith.mulf %53, %30 : vector<8x128xf32>
    %cst_26 = arith.constant -0.00168282702 : f32
    %55 = vector.broadcast %cst_26 : f32 to vector<8x128xf32>
    %56 = arith.addf %54, %55 : vector<8x128xf32>
    %57 = arith.mulf %56, %30 : vector<8x128xf32>
    %cst_27 = arith.constant -0.00737332925 : f32
    %58 = vector.broadcast %cst_27 : f32 to vector<8x128xf32>
    %59 = arith.addf %57, %58 : vector<8x128xf32>
    %60 = arith.mulf %59, %30 : vector<8x128xf32>
    %cst_28 = arith.constant -0.0142647391 : f32
    %61 = vector.broadcast %cst_28 : f32 to vector<8x128xf32>
    %62 = arith.addf %60, %61 : vector<8x128xf32>
    %63 = arith.mulf %29, %29 : vector<8x128xf32>
    %cst_29 = arith.constant -2.72614237E-10 : f32
    %64 = vector.broadcast %cst_29 : f32 to vector<8x128xf32>
    %65 = arith.mulf %64, %63 : vector<8x128xf32>
    %cst_30 = arith.constant 2.77068146E-8 : f32
    %66 = vector.broadcast %cst_30 : f32 to vector<8x128xf32>
    %67 = arith.addf %65, %66 : vector<8x128xf32>
    %68 = arith.mulf %67, %63 : vector<8x128xf32>
    %cst_31 = arith.constant -2.10102394E-6 : f32
    %69 = vector.broadcast %cst_31 : f32 to vector<8x128xf32>
    %70 = arith.addf %68, %69 : vector<8x128xf32>
    %71 = arith.mulf %70, %63 : vector<8x128xf32>
    %cst_32 = arith.constant -5.69250624E-5 : f32
    %72 = vector.broadcast %cst_32 : f32 to vector<8x128xf32>
    %73 = arith.addf %71, %72 : vector<8x128xf32>
    %74 = arith.mulf %73, %63 : vector<8x128xf32>
    %cst_33 = arith.constant -7.34990637E-4 : f32
    %75 = vector.broadcast %cst_33 : f32 to vector<8x128xf32>
    %76 = arith.addf %74, %75 : vector<8x128xf32>
    %77 = arith.mulf %76, %63 : vector<8x128xf32>
    %cst_34 = arith.constant -2.954600e-03 : f32
    %78 = vector.broadcast %cst_34 : f32 to vector<8x128xf32>
    %79 = arith.addf %77, %78 : vector<8x128xf32>
    %80 = arith.mulf %79, %63 : vector<8x128xf32>
    %cst_35 = arith.constant -0.0160960332 : f32
    %81 = vector.broadcast %cst_35 : f32 to vector<8x128xf32>
    %82 = arith.addf %80, %81 : vector<8x128xf32>
    %cst_36 = arith.constant -1.45660715E-5 : f32
    %83 = vector.broadcast %cst_36 : f32 to vector<8x128xf32>
    %84 = arith.mulf %83, %63 : vector<8x128xf32>
    %cst_37 = arith.constant -2.13374049E-4 : f32
    %85 = vector.broadcast %cst_37 : f32 to vector<8x128xf32>
    %86 = arith.addf %84, %85 : vector<8x128xf32>
    %87 = arith.mulf %86, %63 : vector<8x128xf32>
    %cst_38 = arith.constant -0.00168282702 : f32
    %88 = vector.broadcast %cst_38 : f32 to vector<8x128xf32>
    %89 = arith.addf %87, %88 : vector<8x128xf32>
    %90 = arith.mulf %89, %63 : vector<8x128xf32>
    %cst_39 = arith.constant -0.00737332925 : f32
    %91 = vector.broadcast %cst_39 : f32 to vector<8x128xf32>
    %92 = arith.addf %90, %91 : vector<8x128xf32>
    %93 = arith.mulf %92, %63 : vector<8x128xf32>
    %cst_40 = arith.constant -0.0142647391 : f32
    %94 = vector.broadcast %cst_40 : f32 to vector<8x128xf32>
    %95 = arith.addf %93, %94 : vector<8x128xf32>
    %96 = arith.mulf %22, %49 : vector<8x128xf32>
    %97 = arith.mulf %96, %95 : vector<8x128xf32>
    %98 = arith.mulf %29, %82 : vector<8x128xf32>
    %99 = arith.mulf %98, %62 : vector<8x128xf32>
    %100 = arith.subf %97, %99 : vector<8x128xf32>
    %cst_41 = arith.constant 5.000000e-01 : f32
    %101 = vector.broadcast %cst_41 : f32 to vector<8x128xf32>
    %102 = arith.mulf %101, %100 : vector<8x128xf32>
    %103 = arith.mulf %62, %95 : vector<8x128xf32>
    %104 = arith.divf %102, %103 : vector<8x128xf32>
    %cst_42 = arith.constant 9.99999997E-7 : f32
    %105 = vector.broadcast %cst_42 : f32 to vector<8x128xf32>
    %106 = arith.maximumf %104, %105 : vector<8x128xf32>
    %c0_43 = arith.constant 0 : index
    %c0_44 = arith.constant 0 : index
    %c0_45 = arith.constant 0 : index
    %107 = vector.load %arg4[%c0_43, %c0_44, %c0_45] : memref<1x8x128xf32, #tpu.memory_space<vmem>>, vector<1x8x128xf32>
    %108 = vector.shape_cast %107 : vector<1x8x128xf32> to vector<8x128xf32>
    %109 = vector.shape_cast %106 : vector<8x128xf32> to vector<1x8x128xf32>
    tpu.vector_store %arg4[%c0_43, %c0_44, %c0_45], %109 {strides = array<i32>} : memref<1x8x128xf32, #tpu.memory_space<vmem>>, vector<1x8x128xf32>,
    return
  }
  func.func @transform_0(%arg0: i32, %arg1: i32) -> (i32, i32, i32) {
    %c0_i32 = arith.constant 0 : i32
    %c0_i32_0 = arith.constant 0 : i32
    return %arg0, %arg1, %c0_i32 : i32, i32, i32
  }
  func.func @transform_1(%arg0: i32, %arg1: i32) -> (i32, i32, i32, i32) {
    %c0_i32 = arith.constant 0 : i32
    %c0_i32_0 = arith.constant 0 : i32
    %c0_i32_1 = arith.constant 0 : i32
    return %arg0, %c0_i32, %arg1, %c0_i32_0 : i32, i32, i32, i32
  }
  func.func @transform_2(%arg0: i32, %arg1: i32) -> (i32, i32, i32) {
    %c0_i32 = arith.constant 0 : i32
    %c0_i32_0 = arith.constant 0 : i32
    return %arg0, %arg1, %c0_i32 : i32, i32, i32
  }
}

</mosaic_0001>

<bundles_post_ra>
// kernel: distribution_for_entropy_forward.1
= control target key start
LH: loop header
LB: loop body
LE: loop exit
PB: predicated region body
PF: predicated region fallthrough
CT: control target
= control target key end

     0   :  { %s461_s9 = smov 0   ;;  %s463_s10 = smov 0   ;;  %s505_s0 = inlined_call_operand.vmem [shape: f32[2,8,128], index: 0, kind: input, shape index: {}]   ;;  %s506_s1 = inlined_call_operand.vmem [shape: f32[2,2,8,128], index: 1, kind: input, shape index: {}]   ;;  %s507_s2 = inlined_call_operand.vmem [shape: f32[2,8,128], index: 2, kind: output, shape index: {}]  }
   0x1   :  { %s465_s11 = smov 0  }
   0x2 LB: > { %s24_s12 = sadd.s32 1, %s440_s10  ;;  %p382_p0 = scmp.ge.s32.totalorder %s444_s11, 1  ;;  %s444_s11 = sphi %s465_s11, %s12_s11   ;;  %s440_s10 = sphi %s463_s10, %s509_s10   ;;  %s436_s9 = sphi %s461_s9, %s508_s9  }
   0x3   : > { %p26_p1 = scmp.ge.s32.totalorder %s24_s12, 2  ;;  %p145_p2 = scmp.lt.s32.totalorder %s444_s11, 3 }
   0x5   : > { %s511_s12 = smov (%p26_p1, %s24_s12), 0  ;;  %p146_p3 = pnand %p382_p0, %p145_p2 }
   0x6   : > { %p179_p4 = scmp.lt.s32.totalorder (!%p146_p3), %s436_s9, 1 }
   0x7   : > { %149 = sbr.rel (%p146_p3) target bundleno = 80 (0x50), region = 28 }
   0xc   : > { %s513_s9 = smov (!%p179_p4, %s436_s9), 1 }
   0xd   : > { %s393_s13 = sshll.u32 %s513_s9, 4  ;;  %s383_s17 = sshll.u32 %s513_s9, 3 }
   0xe   : > { %s193_s16 = scalar_lea.vmem %s506_s1, %s393_s13  ;;  %s185_s20 = scalar_lea.vmem %s505_s0, %s383_s17 }
   0xf   : > { %v387_v0 = vld [vmem:[%s193_s16 + $0x8] sm:$0xff]  ;;  %v201_v2 = vld [vmem:[%s185_s20] sm:$0xff]  ;;  %s200_s23 = scalar_lea.vmem %s507_s2, %s383_s17 }
  0x10   : > { %v205_v1 = vmax.f32 %v387_v0, 1e-09  ;;  %v202_v3 = vld [vmem:[%s193_s16] sm:$0xff] }
  0x11   : > { %v211_v6 = vsub.f32 %v201_v2, %v202_v3 }
  0x12   : > { %418 = vrcp.f32 %v205_v1 }
  0x13   : > { %v212_v9 = vadd.f32 0.5, %v211_v6  ;;  %v389_v10 = vadd.f32 -0.5, %v211_v6 }
  0x18   : > { %v419_v4 = vpop.eup %418 }
  0x19   : > { %v207_v5 = vmul.f32 %v419_v4, %v205_v1 }
  0x1b   : > { %v208_v7 = vsub.f32 2.0, %v207_v5 }
  0x1d   : > { %v209_v8 = vmul.f32 %v419_v4, %v208_v7 }
  0x1f   : > { %v210_v11 = vmul.f32 0.70710677, %v209_v8 }
  0x21   : > { %v213_v12 = vmul.f32 %v212_v9, %v210_v11  ;;  %v217_v13 = vmul.f32 %v389_v10, %v210_v11 }
  0x23   : > { %v388_v14 = vclamps-f32 %v213_v12, 4.0  ;;  %v390_v15 = vclamps-f32 %v217_v13, 4.0 }
  0x25   : > { %v220_v16 = vmul.f32 %v388_v14, %v388_v14  ;;  %v241_v17 = vmul.f32 %v390_v15, %v390_v15 }
  0x27   : > { %v221_v18 = vmul.f32 -2.7261424e-10, %v220_v16  ;;  %v233_v19 = vmul.f32 -1.45660715e-05, %v220_v16  ;;  %v242_v20 = vmul.f32 -2.7261424e-10, %v241_v17 }
  0x28   : > { %v254_v21 = vmul.f32 -1.45660715e-05, %v241_v17 }
  0x29   : > { %v222_v22 = vadd.f32 2.7706815e-08, %v221_v18  ;;  %v234_v23 = vadd.f32 -0.00021337405, %v233_v19  ;;  %v243_v24 = vadd.f32 2.7706815e-08, %v242_v20 }
  0x2a   : > { %v255_v25 = vadd.f32 -0.00021337405, %v254_v21 }
  0x2b   : > { %v223_v26 = vmul.f32 %v222_v22, %v220_v16  ;;  %v235_v27 = vmul.f32 %v234_v23, %v220_v16  ;;  %v244_v28 = vmul.f32 %v243_v24, %v241_v17 }
  0x2c   : > { %v256_v29 = vmul.f32 %v255_v25, %v241_v17 }
  0x2d   : > { %v224_v30 = vadd.f32 -2.101024e-06, %v223_v26  ;;  %v236_v31 = vadd.f32 -0.001682827, %v235_v27  ;;  %v245_v32 = vadd.f32 -2.101024e-06, %v244_v28 }
  0x2e   : > { %v257_v33 = vadd.f32 -0.001682827, %v256_v29 }
  0x2f   : > { %v225_v34 = vmul.f32 %v224_v30, %v220_v16  ;;  %v237_v35 = vmul.f32 %v236_v31, %v220_v16  ;;  %v246_v36 = vmul.f32 %v245_v32, %v241_v17 }
  0x30   : > { %v258_v37 = vmul.f32 %v257_v33, %v241_v17 }
  0x31   : > { %v226_v38 = vadd.f32 -5.6925062e-05, %v225_v34  ;;  %v238_v39 = vadd.f32 -0.0073733293, %v237_v35  ;;  %v247_v40 = vadd.f32 -5.6925062e-05, %v246_v36 }
  0x32   : > { %v259_v41 = vadd.f32 -0.0073733293, %v258_v37 }
  0x33   : > { %v227_v42 = vmul.f32 %v226_v38, %v220_v16  ;;  %v239_v43 = vmul.f32 %v238_v39, %v220_v16  ;;  %v248_v44 = vmul.f32 %v247_v40, %v241_v17 }
  0x34   : > { %v260_v45 = vmul.f32 %v259_v41, %v241_v17 }
  0x35   : > { %v228_v46 = vadd.f32 -0.00073499064, %v227_v42  ;;  %v240_v47 = vadd.f32 -0.014264739, %v239_v43  ;;  %v249_v48 = vadd.f32 -0.00073499064, %v248_v44 }
  0x36   : > { %v261_v49 = vadd.f32 -0.014264739, %v260_v45 }
  0x37   : > { %v229_v50 = vmul.f32 %v228_v46, %v220_v16  ;;  %v250_v51 = vmul.f32 %v249_v48, %v241_v17 }
  0x38   : > { %v268_v52 = vmul.f32 %v261_v49, %v240_v47 }
  0x39   : > { %v230_v53 = vadd.f32 -0.0029546, %v229_v50  ;;  %v251_v54 = vadd.f32 -0.0029546, %v250_v51 }
  0x3a   : > { %420 = vrcp.f32 %v268_v52  ;;  %vm274_vm0 = vweird.f32 %v268_v52  ;;  %v280_v1 = vand.u32 2147483648, %v268_v52  ;;  %v278_v4 = vand.u32 2147483647, %v268_v52 }
  0x3b   : > { %v231_v55 = vmul.f32 %v230_v53, %v220_v16  ;;  %v252_v56 = vmul.f32 %v251_v54, %v241_v17 }
  0x3c   : > { %v281_v6 = vor.u32 1.1754944e-38, %v280_v1  ;;  %vm279_vm3 = vcmp.eq.f32.partialorder %v278_v4, 8.507059e+37 }
  0x3d   : > { %v232_v57 = vadd.f32 -0.016096033, %v231_v55  ;;  %v253_v58 = vadd.f32 -0.016096033, %v252_v56 }
  0x3f   : > { %v262_v59 = vmul.f32 %v388_v14, %v232_v57  ;;  %v264_v60 = vmul.f32 %v390_v15, %v253_v58 }
  0x40   : > { %v421_v61 = vpop.eup %420 }
  0x41   : > { %v263_v62 = vmul.f32 %v262_v59, %v261_v49  ;;  %v265_v63 = vmul.f32 %v264_v60, %v240_v47  ;;  %v270_v0 = vmul.f32 %v421_v61, %v268_v52  ;;  %vm275_vm1 = vweird.f32 %v421_v61 }
  0x42   : > { %vm276_vm2 = vmor %vm274_vm0, %vm275_vm1 }
  0x43   : > { %v266_v2 = vsub.f32 %v263_v62, %v265_v63  ;;  %v271_v3 = vsub.f32 1.0, %v270_v0 }
  0x45   : > { %v272_v5 = vmul.f32 %v421_v61, %v271_v3  ;;  %v267_v7 = vmul.f32 0.5, %v266_v2 }
  0x47   : > { %v273_v8 = vadd.f32 %v421_v61, %v272_v5 }
  0x49   : > { %v277_v9 = vsel %vm276_vm2, %v421_v61, %v273_v8 }
  0x4a   : > { %v282_v10 = vsel %vm279_vm3, %v281_v6, %v277_v9 }
  0x4b   : > { %v283_v11 = vmul.f32 %v282_v10, %v267_v7 }
  0x4d   : > { %v284_v12 = vmax.f32 %v283_v11, 1e-06 }
  0x4f   : > { %285 = vst [vmem:[%s200_s23] sm:$0xff] %v284_v12 }
  0x50 PF: > { %s12_s11 = sadd.s32 1, %s444_s11   ;;  %s508_s9 = smov %s440_s10 }
  0x51   : > { %p9_p5 = scmp.ge.s32.totalorder %s12_s11, 4   ;;  %s509_s10 = smov %s511_s12 }
  0x53   :  { %11 = sbr.rel (!%p9_p5) target bundleno = 2 (0x2), region = 62 }

</bundles_post_ra>
